<compile_context>
chip_gen: v7x
topology: tpu7x:2x2x1
jax: 0.10.0
libtpu: 0.0.40
codegen_flags: <defaults>
</compile_context>

<pallas_src>
import functools
import itertools

import numpy as np
import jax
import jax.numpy as jnp
from jax.experimental import pallas as pl
from jax.experimental.pallas import tpu as pltpu


# ----------------------------------------------------------------------------
# Constant DCT basis (identical to the PyTorch __init__), baked with numpy.
# ----------------------------------------------------------------------------
def _make_dct_params_np():
    t = np.zeros((8, 8, 8, 8), dtype=np.float32)
    for x, y, u, v in itertools.product(range(8), repeat=4):
        t[x, y, u, v] = np.cos((2 * x + 1) * u * np.pi / 16) * np.cos(
            (2 * y + 1) * v * np.pi / 16
        )
    alpha = np.array([1.0 / np.sqrt(2)] + [1.0] * 7)
    scale = (np.outer(alpha, alpha) * 0.25).astype(np.float32)
    return t, scale


_T_NP, _SCALE_NP = _make_dct_params_np()
# Fold scale into the basis columns, then duplicate block-diagonally so both
# the contraction width and the output lane width are 128.
_T128_NP = np.kron(
    np.eye(2, dtype=np.float32),
    (_T_NP.reshape(64, 64) * _SCALE_NP.reshape(1, 64)),
).astype(np.float32)                       # (128, 128)


# ----------------------------------------------------------------------------
# Kernel
# ----------------------------------------------------------------------------
def _dct8x8_kernel(x_ref, t_ref, o_ref):
    # x_ref: (TR, 128) — two packed 8x8 blocks per row.
    # t_ref: (128, 128) — kron(eye(2), T * scale), block-diagonal, constant.
    # o_ref: (TR, 128) — lane-dense output (full-width vst).
    x = x_ref[...] - 128.0
    o_ref[...] = jnp.dot(x, t_ref[...], preferred_element_type=jnp.float32)


def _round_up(x, m):
    return ((x + m - 1) // m) * m


# ----------------------------------------------------------------------------
# Wrapper
# ----------------------------------------------------------------------------
@functools.partial(jax.jit, static_argnames=("tile_rows",))
def dct8x8(image, *, tile_rows=8192):
    """image: (N, 8, 8) f32 -> (N, 8, 8) f32 DCT coefficients."""
    n = image.shape[0]
    assert image.shape[1:] == (8, 8)
    if n == 0:
        return jnp.zeros((0, 8, 8), jnp.float32)

    m = pl.cdiv(n, 2)                       # packed 128-wide rows needed

    # Tile choice: as large as possible (HBM streaming), split into an EVEN
    # number of tiles (>= 2 when the batch allows) so the single "parallel"
    # grid axis balances across v7x's two TensorCores.
    if m <= 8:
        tr = 8
    else:
        nt = max(2, pl.cdiv(m, tile_rows))
        nt = _round_up(nt, 2)               # even tile count
        tr = max(8, _round_up(pl.cdiv(m, nt), 8))
    num_tiles = pl.cdiv(m, tr)
    if num_tiles > 1 and num_tiles % 2:     # rare rounding edge: keep it even
        num_tiles += 1
    m_pad = num_tiles * tr

    # Single merged pad (even-batch pad + tile pad), then lane-dense repack.
    x_flat = image.reshape(n, 64).astype(jnp.float32)
    rows_pad = 2 * m_pad
    if rows_pad != n:
        x_flat = jnp.pad(x_flat, ((0, rows_pad - n), (0, 0)))
    x2 = x_flat.reshape(m_pad, 128)

    t128 = jnp.asarray(_T128_NP)            # baked constant under jit

    # VMEM budget: double-buffered in + out tiles, subtract temp, basis
    # (+ headroom).  Explicit limit so v5e's 16 MiB default doesn't block
    # big tiles; capped well under v7x's 64 MiB physical VMEM.
    vmem_bytes = 2 * (2 * tr * 128 * 4) + tr * 128 * 4 + 2 * 128 * 128 * 4
    vmem_limit = min(max(int(vmem_bytes * 1.25) + (2 << 20), 4 << 20), 48 << 20)

    out = pl.pallas_call(
        _dct8x8_kernel,
        out_shape=jax.ShapeDtypeStruct((m_pad, 128), jnp.float32),
        grid_spec=pltpu.PrefetchScalarGridSpec(
            num_scalar_prefetch=0,
            grid=(num_tiles,),
            in_specs=[
                pl.BlockSpec((tr, 128), lambda i: (i, 0)),
                pl.BlockSpec((128, 128), lambda i: (0, 0)),
            ],
            out_specs=pl.BlockSpec((tr, 128), lambda i: (i, 0)),
        ),
        compiler_params=pltpu.CompilerParams(
            dimension_semantics=("parallel",),
            vmem_limit_bytes=vmem_limit,
        ),
    )(x2, t128)

    # Unpack: 128-wide rows -> 64-wide blocks, drop padding, restore (N, 8, 8).
    return out.reshape(2 * m_pad, 64)[:n].reshape(n, 8, 8)


# ----------------------------------------------------------------------------
# Pure-JAX reference mirroring the PyTorch forward.
# ----------------------------------------------------------------------------
def dct8x8_ref(image, tensor, scale):
    x = image.astype(jnp.float32) - 128.0
    r = jnp.tensordot(x, tensor, axes=2)    # contract last-2 of x with first-2 of T
    return scale * r


if __name__ == "__main__":
    key = jax.random.PRNGKey(0)
    batch = 37  # odd, exercises the single merged pad / unpack path
    # pixel-like values in [0, 255]
    image = jax.random.uniform(key, (batch, 8, 8), jnp.float32, 0.0, 255.0)

    out = dct8x8(image)
    out = jax.block_until_ready(out)

    ref = dct8x8_ref(image, jnp.asarray(_T_NP), jnp.asarray(_SCALE_NP))
    np.testing.assert_allclose(np.asarray(out), np.asarray(ref), rtol=1e-5, atol=2e-3)

    print("KERNEL_OK")
</pallas_src>

<mosaic_0001>
module attributes {stable_mosaic.version = 11 : i64} {
  func.func @_dct8x8_kernel(%arg0: i32, %arg1: memref<16x128xf32, #tpu.memory_space<vmem>>, %arg2: memref<128x128xf32, #tpu.memory_space<vmem>>, %arg3: memref<16x128xf32, #tpu.memory_space<vmem>>) attributes {dimension_semantics = [#tpu.dimension_semantics<parallel>], iteration_bounds = array<i64: 2>, scalar_prefetch = 0 : i64, scratch_operands = 0 : i64, tpu.core_type = #tpu.core_type<tc>, window_params = [{transform_indices = @transform_0, window_bounds = array<i64: 16, 128>}, {pipeline_mode = #tpu.pipeline_mode<synchronous>, transform_indices = @transform_1, window_bounds = array<i64: 128, 128>}, {transform_indices = @transform_2, window_bounds = array<i64: 16, 128>}]} {
    %c0 = arith.constant 0 : index
    %c0_0 = arith.constant 0 : index
    %0 = vector.load %arg1[%c0, %c0_0] : memref<16x128xf32, #tpu.memory_space<vmem>>, vector<16x128xf32>
    %cst = arith.constant 1.280000e+02 : f32
    %1 = vector.broadcast %cst : f32 to vector<16x128xf32>
    %2 = arith.subf %0, %1 : vector<16x128xf32>
    %c0_1 = arith.constant 0 : index
    %c0_2 = arith.constant 0 : index
    %3 = vector.load %arg2[%c0_1, %c0_2] : memref<128x128xf32, #tpu.memory_space<vmem>>, vector<128x128xf32>
    %cst_3 = arith.constant dense<0.000000e+00> : vector<16x128xf32>
    %4 = tpu.matmul %2, %3, %cst_3 {dimension_numbers = #tpu.dot_dimension_numbers<[1], [0], [0], [1], [0, 0, 1, 1], [], []>} : vector<16x128xf32>, vector<128x128xf32>, vector<16x128xf32> -> vector<16x128xf32>
    %c0_4 = arith.constant 0 : index
    %c0_5 = arith.constant 0 : index
    %5 = vector.load %arg3[%c0_4, %c0_5] : memref<16x128xf32, #tpu.memory_space<vmem>>, vector<16x128xf32>
    tpu.vector_store %arg3[%c0_4, %c0_5], %4 {strides = array<i32>} : memref<16x128xf32, #tpu.memory_space<vmem>>, vector<16x128xf32>,
    return
  }
  func.func @transform_0(%arg0: i32) -> (i32, i32) {
    %c0_i32 = arith.constant 0 : i32
    %c0_i32_0 = arith.constant 0 : i32
    return %arg0, %c0_i32 : i32, i32
  }
  func.func @transform_1(%arg0: i32) -> (i32, i32) {
    %c0_i32 = arith.constant 0 : i32
    %c0_i32_0 = arith.constant 0 : i32
    %c0_i32_1 = arith.constant 0 : i32
    return %c0_i32, %c0_i32_0 : i32, i32
  }
  func.func @transform_2(%arg0: i32) -> (i32, i32) {
    %c0_i32 = arith.constant 0 : i32
    %c0_i32_0 = arith.constant 0 : i32
    return %arg0, %c0_i32 : i32, i32
  }
}

</mosaic_0001>

<bundles_post_ra>
// kernel: dct8x8.1
= control target key start
LH: loop header
LB: loop body
LE: loop exit
PB: predicated region body
PF: predicated region fallthrough
CT: control target
= control target key end

     0   :  { %s429_s9 = smov 0   ;;  %s501_s0 = inlined_call_operand.vmem [shape: f32[32,128], index: 0, kind: input, shape index: {}]   ;;  %s502_s1 = inlined_call_operand.vmem [shape: f32[128,128], index: 1, kind: input, shape index: {}]   ;;  %s503_s2 = inlined_call_operand.vmem [shape: f32[32,128], index: 2, kind: output, shape index: {}]  }
   0x1 LB: > { %s300_s10 = sadd.s32 4294967295, %s412_s9   ;;  %p304_p0 = scmp.ge.s32.totalorder %s412_s9, 1  ;;  %s412_s9 = sphi %s429_s9, %s12_s9  }
   0x2   : > { %p113_p1 = scmp.lt.s32.totalorder %s412_s9, 3 }
   0x4   : > { %p114_p2 = pnand %p304_p0, %p113_p1 }
   0x5   : > { %v151_v0 = vld [vmem:[%s502_s1] sm:$0xff] (!%p114_p2)  ;;  %v152_v1 = vld [vmem:[%s502_s1 + $0x8] sm:$0xff] (!%p114_p2)  ;;  %v153_v2 = vld [vmem:[%s502_s1 + $0x10] sm:$0xff] (!%p114_p2)  ;;  %s305_s17 = sshll.u32 (!%p114_p2), %s300_s10, 1 }
   0x6   : > { %117 = sbr.rel (%p114_p2) target bundleno = 254 (0xfe), region = 28  ;;  %v366_v3 = vpack.c.bf16 (!%p114_p2), %v152_v1, %v151_v0  ;;  %v154_v4 = vld [vmem:[%s502_s1 + $0x18] sm:$0xff] (!%p114_p2)  ;;  %p136_p3 = scmp.lt.s32.totalorder (!%p114_p2), %s305_s17, 3  ;;  %v155_v6 = vld [vmem:[%s502_s1 + $0x20] sm:$0xff] (!%p114_p2)  ;;  %v156_v7 = vld [vmem:[%s502_s1 + $0x28] sm:$0xff] (!%p114_p2) }
   0x7   : > { %v370_v5 = vpack.c.bf16 (!%p114_p2), %v154_v4, %v153_v2  ;;  %v374_v8 = vpack.c.bf16 (!%p114_p2), %v156_v7, %v155_v6  ;;  %v157_v9 = vld [vmem:[%s502_s1 + $0x30] sm:$0xff] (!%p114_p2)  ;;  %v158_v10 = vld [vmem:[%s502_s1 + $0x38] sm:$0xff] (!%p114_p2)  ;;  %v159_v14 = vld [vmem:[%s502_s1 + $0x40] sm:$0xff] (!%p114_p2) }
   0x8   : > { %367 = vmatprep.subr.bf16.mxu0 (!%p114_p2), %v366_v3  ;;  %v378_v13 = vpack.c.bf16 (!%p114_p2), %v158_v10, %v157_v9  ;;  %v160_v15 = vld [vmem:[%s502_s1 + $0x48] sm:$0xff] (!%p114_p2)  ;;  %v161_v17 = vld [vmem:[%s502_s1 + $0x50] sm:$0xff] (!%p114_p2)  ;;  %v162_v18 = vld [vmem:[%s502_s1 + $0x58] sm:$0xff] (!%p114_p2) }
   0x9   : > { %369 = vmatpush3.bf16.msra.mxu0 (!%p114_p2), %v366_v3  ;;  %v382_v16 = vpack.c.bf16 (!%p114_p2), %v160_v15, %v159_v14  ;;  %v386_v19 = vpack.c.bf16 (!%p114_p2), %v162_v18, %v161_v17  ;;  %v163_v20 = vld [vmem:[%s502_s1 + $0x60] sm:$0xff] (!%p114_p2)  ;;  %v164_v21 = vld [vmem:[%s502_s1 + $0x68] sm:$0xff] (!%p114_p2)  ;;  %v165_v23 = vld [vmem:[%s502_s1 + $0x70] sm:$0xff] (!%p114_p2) }
   0xa   : > { %371 = vmatprep.subr.bf16.mxu0 (!%p114_p2), %v370_v5  ;;  %v390_v22 = vpack.c.bf16 (!%p114_p2), %v164_v21, %v163_v20  ;;  %v166_v24 = vld [vmem:[%s502_s1 + $0x78] sm:$0xff] (!%p114_p2) }
   0xb   : > { %v394_v25 = vpack.c.bf16 (!%p114_p2), %v166_v24, %v165_v23 }
   0xd   : > { %s505_s17 = smov (!%p136_p3, %s305_s17), 3  ;;  %373 = vmatpush3.bf16.msra.mxu0 %v370_v5 }
   0xe   : > { %s306_s24 = sshll.u32 %s505_s17, 3  ;;  %375 = vmatprep.subr.bf16.mxu0 %v374_v8 }
   0xf   : > { %s139_s3 = scalar_lea.vmem %s501_s0, %s306_s24  ;;  %s145_s25 = scalar_lea.vmem %s503_s2, %s306_s24 }
  0x10   : > { %v147_v11 = vld [vmem:[%s139_s3] sm:$0xff]  ;;  %v148_v26 = vld [vmem:[%s139_s3 + $0x8] sm:$0xff] }
  0x11   : > { %v309_v12 = vadd.f32 -128.0, %v147_v11  ;;  %377 = vmatpush3.bf16.msra.mxu0 %v374_v8  ;;  %v310_v27 = vadd.f32 -128.0, %v148_v26 }
  0x12   : > { %379 = vmatprep.subr.bf16.mxu0 %v378_v13 }
  0x13   : > { %363 = vmatprep.mubr.f32.mxu0 %v309_v12 }
  0x15   : > { %381 = vmatpush3.bf16.msra.mxu0 %v378_v13 }
  0x16   : > { %383 = vmatprep.subr.bf16.mxu0 %v382_v16 }
  0x19   : > { %385 = vmatpush3.bf16.msra.mxu0 %v382_v16 }
  0x1a   : > { %387 = vmatprep.subr.bf16.mxu0 %v386_v19 }
  0x1d   : > { %389 = vmatpush3.bf16.msra.mxu0 %v386_v19 }
  0x1e   : > { %391 = vmatprep.subr.bf16.mxu0 %v390_v22 }
  0x21   : > { %393 = vmatpush3.bf16.msra.mxu0 %v390_v22 }
  0x22   : > { %395 = vmatprep.subr.bf16.mxu0 %v394_v25 }
  0x25   : > { %397 = vmatpush3.bf16.msra.mxu0 %v394_v25 }
  0x28   : > { %364 = vmatmul.mubr.f32.vlgmr.msra.gmra.mrb[0].mxu0 %v310_v27 }
  0xfb   : > { %v365_v28 = vpop.f32.mrb[0].mxu0 }
  0xfc   : > { %v233_v29 = vpop.f32.mrb[1].mxu0  ;;  %243 = vst [vmem:[%s145_s25 + $0x8] sm:$0xff] %v365_v28 }
  0xfd   : > { %242 = vst [vmem:[%s145_s25] sm:$0xff] %v233_v29 }
  0xfe PF: > { %s12_s9 = sadd.s32 1, %s412_s9  }
  0xff   : > { %p9_p4 = scmp.ge.s32.totalorder %s12_s9, 4  }
 0x101   :  { %11 = sbr.rel (!%p9_p4) target bundleno = 1 (0x1), region = 58 }

</bundles_post_ra>
